<compile_context>
chip_gen: v7x
topology: tpu7x:2x2x1
jax: 0.10.0
libtpu: 0.0.40
codegen_flags: <defaults>
</compile_context>

<pallas_src>
import functools

import jax
import jax.numpy as jnp
from jax import lax
from jax.experimental import pallas as pl
from jax.experimental.pallas import tpu as pltpu


# ----------------------------- Pallas kernel --------------------------------
def _bottleneck_kernel(x_ref, w1_ref, b1_ref, w2_ref, b2_ref, w3_ref, b3_ref,
                       mask_ref, o_ref, slab_ref, *, W, Cmid):
    """Fused 1x1 -> 3x3 -> 1x1 bottleneck for one image, channels-first (C, P)."""
    Pp = x_ref.shape[-1]                                           # padded pixel count
    x = x_ref[...]                                                 # (Cin, Pp)

    # ---- conv1 (1x1) + BN1 + ReLU  (BN1 scale pre-folded into w1) ----
    y1 = jnp.dot(w1_ref[...], x, preferred_element_type=jnp.float32)
    y1 = jnp.maximum(y1 + b1_ref[...], 0.0).astype(x.dtype)        # (Cmid, Pp)

    # ---- conv2 (3x3, stride=1, pad=1): build K-stacked tap slab (9*Cmid, Pp) ----
    # tap t = 3*ky + kx ; roll the flattened pixel axis by the tap offset (XLU),
    # zero out-of-image positions with the precomputed validity mask.
    for t in range(9):
        dy, dx = t // 3 - 1, t % 3 - 1
        d = dy * W + dx
        tap = y1 if d == 0 else pltpu.roll(y1, shift=(-d) % Pp, axis=1) * mask_ref[t]
        slab_ref[pl.ds(t * Cmid, Cmid), :] = tap

    # ---- conv2 as ONE MXU matmul (K = 9*Cmid) + BN2 + ReLU ----
    y2 = jnp.dot(w2_ref[...], slab_ref[...], preferred_element_type=jnp.float32)
    y2 = jnp.maximum(y2 + b2_ref[...], 0.0).astype(x.dtype)        # (Cmid, Pp)

    # ---- conv3 (1x1) + BN3 + identity residual + ReLU ----
    y3 = jnp.dot(w3_ref[...], y2, preferred_element_type=jnp.float32)
    y3 = y3 + b3_ref[...] + x.astype(jnp.float32)
    o_ref[...] = jnp.maximum(y3, 0.0).astype(o_ref.dtype)


# ------------------------------ JAX wrapper ----------------------------------
def bottleneck_forward(x_nchw, params, *, eps=1e-5, compute_dtype=jnp.bfloat16):
    """Pallas implementation of Bottleneck.forward (stride=1, downsample=None)."""
    N, Cin, H, W = x_nchw.shape
    P = H * W
    P_pad = ((P + 127) // 128) * 128            # lane-dense pixel axis
    out_dtype = x_nchw.dtype

    w1 = params["conv1_w"]                       # (Cmid, Cin, 1, 1)
    w2 = params["conv2_w"]                       # (Cmid, Cmid, 3, 3)
    w3 = params["conv3_w"]                       # (Cout, Cmid, 1, 1)
    Cmid, Cout = w1.shape[0], w3.shape[0]
    if Cout != Cin:
        raise NotImplementedError("identity shortcut requires inplanes == 4 * planes")

    def fold_bn(w_oc_first, gamma, beta, mean, var):
        inv_std = 1.0 / jnp.sqrt(var + eps)
        scale = gamma * inv_std
        w_f = w_oc_first * scale.reshape((-1,) + (1,) * (w_oc_first.ndim - 1))
        b_f = beta - mean * scale
        return w_f, b_f

    w1f, b1f = fold_bn(w1.reshape(Cmid, Cin),
                       params["bn1_gamma"], params["bn1_beta"],
                       params["bn1_mean"], params["bn1_var"])
    w2f, b2f = fold_bn(w2,
                       params["bn2_gamma"], params["bn2_beta"],
                       params["bn2_mean"], params["bn2_var"])
    w3f, b3f = fold_bn(w3.reshape(Cout, Cmid),
                       params["bn3_gamma"], params["bn3_beta"],
                       params["bn3_mean"], params["bn3_var"])

    # (Cmid_out, Cmid_in, 3, 3) -> K-stacked slab (Cmid_out, 9*Cmid_in),
    # column block t = 3*ky + kx holds the weights for tap (ky, kx).
    w2_slab = jnp.transpose(w2f, (0, 2, 3, 1)).reshape(Cmid, 9 * Cmid)

    # Per-tap validity masks over the (padded) flattened pixel axis.
    hh = jnp.repeat(jnp.arange(H), W)            # (P,) row index
    ww = jnp.tile(jnp.arange(W), H)              # (P,) col index
    masks = []
    for t in range(9):
        dy, dx = t // 3 - 1, t % 3 - 1
        m = (hh + dy >= 0) & (hh + dy < H) & (ww + dx >= 0) & (ww + dx < W)
        masks.append(jnp.pad(m, (0, P_pad - P)))          # pad columns always masked
    tap_masks = jnp.stack(masks).astype(compute_dtype).reshape(9, 1, P_pad)

    # NCHW -> (N, C, H*W) is a bitcast-level reshape; pad pixel axis to P_pad.
    x_flat = x_nchw.reshape(N, Cin, P).astype(compute_dtype)
    if P_pad != P:
        x_flat = jnp.pad(x_flat, ((0, 0), (0, 0), (0, P_pad - P)))

    args = (
        x_flat,
        w1f.astype(compute_dtype), b1f.reshape(Cmid, 1).astype(jnp.float32),
        w2_slab.astype(compute_dtype), b2f.reshape(Cmid, 1).astype(jnp.float32),
        w3f.astype(compute_dtype), b3f.reshape(Cout, 1).astype(jnp.float32),
        tap_masks,
    )

    # Per-grid-step working-set estimate -> explicit VMEM budget (with headroom).
    cbytes = jnp.dtype(compute_dtype).itemsize
    obytes = jnp.dtype(out_dtype).itemsize
    ws = (2 * Cin * P_pad * cbytes                       # x tile (double-buffered)
          + 2 * Cout * P_pad * obytes                    # out tile (double-buffered)
          + 9 * Cmid * P_pad * cbytes                    # tap slab scratch
          + 2 * 9 * P_pad * cbytes                       # tap masks
          + 2 * (Cmid * Cin + 9 * Cmid * Cmid + Cout * Cmid) * cbytes   # weights
          + 4 * (2 * Cmid + 2 * Cout) * P_pad)           # live f32 intermediates (rough)
    vmem_limit = int(min(48 * 2**20, max(32 * 2**20, 2 * ws)))

    rep2 = lambda n: (0, 0)
    rep3 = lambda n: (0, 0, 0)

    out = pl.pallas_call(
        functools.partial(_bottleneck_kernel, W=W, Cmid=Cmid),
        out_shape=jax.ShapeDtypeStruct((N, Cout, P_pad), out_dtype),
        grid=(N,),
        in_specs=[
            pl.BlockSpec((None, Cin, P_pad), lambda n: (n, 0, 0)),  # x, one image / step
            pl.BlockSpec((Cmid, Cin), rep2),                        # conv1 weight (BN1 folded)
            pl.BlockSpec((Cmid, 1), rep2),                          # BN1 bias
            pl.BlockSpec((Cmid, 9 * Cmid), rep2),                   # conv2 K-stacked weights
            pl.BlockSpec((Cmid, 1), rep2),                          # BN2 bias
            pl.BlockSpec((Cout, Cmid), rep2),                       # conv3 weight (BN3 folded)
            pl.BlockSpec((Cout, 1), rep2),                          # BN3 bias
            pl.BlockSpec((9, 1, P_pad), rep3),                      # tap validity masks
        ],
        out_specs=pl.BlockSpec((None, Cout, P_pad), lambda n: (n, 0, 0)),
        scratch_shapes=[pltpu.VMEM((9 * Cmid, P_pad), compute_dtype)],  # tap slab
        compiler_params=pltpu.CompilerParams(
            dimension_semantics=("parallel",),       # shard images across TCs (v7x)
            vmem_limit_bytes=vmem_limit,
        ),
    )(*args)

    return out[:, :, :P].reshape(N, Cout, H, W)


# ------------------------- reference (pure JAX) -------------------------------
def bottleneck_reference(x, p, eps=1e-5):
    def conv(x, w, pad):
        return lax.conv_general_dilated(
            x, w, window_strides=(1, 1), padding=((pad, pad), (pad, pad)),
            dimension_numbers=("NCHW", "OIHW", "NCHW"))

    def bn(x, g, b, m, v):
        g, b, m, v = (t.reshape(1, -1, 1, 1) for t in (g, b, m, v))
        return (x - m) / jnp.sqrt(v + eps) * g + b

    out = jax.nn.relu(bn(conv(x, p["conv1_w"], 0),
                         p["bn1_gamma"], p["bn1_beta"], p["bn1_mean"], p["bn1_var"]))
    out = jax.nn.relu(bn(conv(out, p["conv2_w"], 1),
                         p["bn2_gamma"], p["bn2_beta"], p["bn2_mean"], p["bn2_var"]))
    out = bn(conv(out, p["conv3_w"], 0),
             p["bn3_gamma"], p["bn3_beta"], p["bn3_mean"], p["bn3_var"])
    return jax.nn.relu(out + x)


# --------------------------------- main ---------------------------------------
if __name__ == "__main__":
    batch, planes, hw = 2, 4, 16
    inplanes = planes * 4            # identity shortcut requires inplanes == planes * expansion

    key = jax.random.PRNGKey(0)
    keys = jax.random.split(key, 17)

    params = {
        "conv1_w": 0.1 * jax.random.normal(keys[0], (planes, inplanes, 1, 1), jnp.float32),
        "conv2_w": 0.1 * jax.random.normal(keys[1], (planes, planes, 3, 3), jnp.float32),
        "conv3_w": 0.1 * jax.random.normal(keys[2], (planes * 4, planes, 1, 1), jnp.float32),
        "bn1_gamma": 1.0 + 0.1 * jax.random.normal(keys[3], (planes,), jnp.float32),
        "bn1_beta": 0.1 * jax.random.normal(keys[4], (planes,), jnp.float32),
        "bn1_mean": 0.05 * jax.random.normal(keys[5], (planes,), jnp.float32),
        "bn1_var": jax.random.uniform(keys[6], (planes,), jnp.float32, 0.5, 1.5),
        "bn2_gamma": 1.0 + 0.1 * jax.random.normal(keys[7], (planes,), jnp.float32),
        "bn2_beta": 0.1 * jax.random.normal(keys[8], (planes,), jnp.float32),
        "bn2_mean": 0.05 * jax.random.normal(keys[9], (planes,), jnp.float32),
        "bn2_var": jax.random.uniform(keys[10], (planes,), jnp.float32, 0.5, 1.5),
        "bn3_gamma": 1.0 + 0.1 * jax.random.normal(keys[11], (planes * 4,), jnp.float32),
        "bn3_beta": 0.1 * jax.random.normal(keys[12], (planes * 4,), jnp.float32),
        "bn3_mean": 0.05 * jax.random.normal(keys[13], (planes * 4,), jnp.float32),
        "bn3_var": jax.random.uniform(keys[14], (planes * 4,), jnp.float32, 0.5, 1.5),
    }

    # ---- main test: 16x16 plane (P = 256, already a multiple of 128) ----
    x = jax.random.normal(keys[15], (batch, inplanes, hw, hw), jnp.float32)
    ref = jax.block_until_ready(bottleneck_reference(x, params))

    out_f32 = jax.block_until_ready(
        bottleneck_forward(x, params, compute_dtype=jnp.float32))
    assert out_f32.shape == (batch, planes * 4, hw, hw), out_f32.shape
    err_f32 = float(jnp.max(jnp.abs(out_f32 - ref)))
    assert jnp.allclose(out_f32, ref, rtol=1e-4, atol=1e-4), err_f32

    # default bf16 operands (f32 accumulation): looser tolerance is expected.
    out_bf16 = jax.block_until_ready(bottleneck_forward(x, params))
    err_bf16 = float(jnp.max(jnp.abs(out_bf16.astype(jnp.float32) - ref)))
    assert err_bf16 < 0.1, err_bf16

    # ---- padding-path test: 12x12 plane (P = 144 -> padded to 256) ----
    x2 = jax.random.normal(keys[16], (batch, inplanes, 12, 12), jnp.float32)
    ref2 = jax.block_until_ready(bottleneck_reference(x2, params))
    out2 = jax.block_until_ready(
        bottleneck_forward(x2, params, compute_dtype=jnp.float32))
    err2 = float(jnp.max(jnp.abs(out2 - ref2)))
    assert jnp.allclose(out2, ref2, rtol=1e-4, atol=1e-4), err2

    print("KERNEL_OK")
</pallas_src>

<mosaic_0001>
module attributes {stable_mosaic.version = 11 : i64} {
  func.func @_bottleneck_kernel(%arg0: i32, %arg1: memref<1x16x256xf32, #tpu.memory_space<vmem>>, %arg2: memref<4x16xf32, #tpu.memory_space<vmem>>, %arg3: memref<4x1xf32, #tpu.memory_space<vmem>>, %arg4: memref<4x36xf32, #tpu.memory_space<vmem>>, %arg5: memref<4x1xf32, #tpu.memory_space<vmem>>, %arg6: memref<16x4xf32, #tpu.memory_space<vmem>>, %arg7: memref<16x1xf32, #tpu.memory_space<vmem>>, %arg8: memref<9x1x256xf32, #tpu.memory_space<vmem>>, %arg9: memref<1x16x256xf32, #tpu.memory_space<vmem>>, %arg10: memref<36x256xf32, #tpu.memory_space<vmem>>) attributes {dimension_semantics = [#tpu.dimension_semantics<parallel>], iteration_bounds = array<i64: 2>, scalar_prefetch = 0 : i64, scratch_operands = 1 : i64, tpu.core_type = #tpu.core_type<tc>, window_params = [{transform_indices = @transform_0, window_bounds = array<i64: 1, 16, 256>}, {pipeline_mode = #tpu.pipeline_mode<synchronous>, transform_indices = @transform_1, window_bounds = array<i64: 4, 16>}, {pipeline_mode = #tpu.pipeline_mode<synchronous>, transform_indices = @transform_2, window_bounds = array<i64: 4, 1>}, {pipeline_mode = #tpu.pipeline_mode<synchronous>, transform_indices = @transform_3, window_bounds = array<i64: 4, 36>}, {pipeline_mode = #tpu.pipeline_mode<synchronous>, transform_indices = @transform_4, window_bounds = array<i64: 4, 1>}, {pipeline_mode = #tpu.pipeline_mode<synchronous>, transform_indices = @transform_5, window_bounds = array<i64: 16, 4>}, {pipeline_mode = #tpu.pipeline_mode<synchronous>, transform_indices = @transform_6, window_bounds = array<i64: 16, 1>}, {pipeline_mode = #tpu.pipeline_mode<synchronous>, transform_indices = @transform_7, window_bounds = array<i64: 9, 1, 256>}, {transform_indices = @transform_8, window_bounds = array<i64: 1, 16, 256>}]} {
    %c0 = arith.constant 0 : index
    %c0_0 = arith.constant 0 : index
    %c0_1 = arith.constant 0 : index
    %0 = vector.load %arg1[%c0, %c0_0, %c0_1] : memref<1x16x256xf32, #tpu.memory_space<vmem>>, vector<1x16x256xf32>
    %1 = vector.shape_cast %0 : vector<1x16x256xf32> to vector<16x256xf32>
    %c0_2 = arith.constant 0 : index
    %c0_3 = arith.constant 0 : index
    %2 = vector.load %arg2[%c0_2, %c0_3] : memref<4x16xf32, #tpu.memory_space<vmem>>, vector<4x16xf32>
    %cst = arith.constant dense<0.000000e+00> : vector<4x256xf32>
    %3 = tpu.matmul %2, %1, %cst {dimension_numbers = #tpu.dot_dimension_numbers<[1], [0], [0], [1], [0, 0, 1, 1], [], []>} : vector<4x16xf32>, vector<16x256xf32>, vector<4x256xf32> -> vector<4x256xf32>
    %c0_4 = arith.constant 0 : index
    %c0_5 = arith.constant 0 : index
    %4 = vector.load %arg3[%c0_4, %c0_5] : memref<4x1xf32, #tpu.memory_space<vmem>>, vector<4x1xf32>
    %5 = vector.broadcast %4 : vector<4x1xf32> to vector<4x256xf32>
    %6 = arith.addf %3, %5 : vector<4x256xf32>
    %cst_6 = arith.constant 0.000000e+00 : f32
    %7 = vector.broadcast %cst_6 : f32 to vector<4x256xf32>
    %8 = arith.maximumf %6, %7 : vector<4x256xf32>
    %c17_i32 = arith.constant 17 : i32
    %9 = tpu.dynamic_rotate %8 by %c17_i32 dim 1 : vector<4x256xf32>, i32 -> vector<4x256xf32>
    %c0_7 = arith.constant 0 : index
    %c0_8 = arith.constant 0 : index
    %c0_9 = arith.constant 0 : index
    %10 = vector.load %arg8[%c0_7, %c0_8, %c0_9] : memref<9x1x256xf32, #tpu.memory_space<vmem>>, vector<1x1x256xf32>
    %11 = vector.shape_cast %10 : vector<1x1x256xf32> to vector<1x256xf32>
    %12 = vector.broadcast %11 : vector<1x256xf32> to vector<4x256xf32>
    %13 = arith.mulf %9, %12 : vector<4x256xf32>
    %c0_10 = arith.constant 0 : index
    %c0_11 = arith.constant 0 : index
    %14 = vector.load %arg10[%c0_10, %c0_11] : memref<36x256xf32, #tpu.memory_space<vmem>>, vector<4x256xf32>
    tpu.vector_store %arg10[%c0_10, %c0_11], %13 {strides = array<i32>} : memref<36x256xf32, #tpu.memory_space<vmem>>, vector<4x256xf32>,
    %c16_i32 = arith.constant 16 : i32
    %15 = tpu.dynamic_rotate %8 by %c16_i32 dim 1 : vector<4x256xf32>, i32 -> vector<4x256xf32>
    %c1 = arith.constant 1 : index
    %c0_12 = arith.constant 0 : index
    %c0_13 = arith.constant 0 : index
    %16 = vector.load %arg8[%c1, %c0_12, %c0_13] : memref<9x1x256xf32, #tpu.memory_space<vmem>>, vector<1x1x256xf32>
    %17 = vector.shape_cast %16 : vector<1x1x256xf32> to vector<1x256xf32>
    %18 = vector.broadcast %17 : vector<1x256xf32> to vector<4x256xf32>
    %19 = arith.mulf %15, %18 : vector<4x256xf32>
    %c4 = arith.constant 4 : index
    %c0_14 = arith.constant 0 : index
    %20 = vector.load %arg10[%c4, %c0_14] : memref<36x256xf32, #tpu.memory_space<vmem>>, vector<4x256xf32>
    tpu.vector_store %arg10[%c4, %c0_14], %19 {strides = array<i32>} : memref<36x256xf32, #tpu.memory_space<vmem>>, vector<4x256xf32>,
    %c15_i32 = arith.constant 15 : i32
    %21 = tpu.dynamic_rotate %8 by %c15_i32 dim 1 : vector<4x256xf32>, i32 -> vector<4x256xf32>
    %c2 = arith.constant 2 : index
    %c0_15 = arith.constant 0 : index
    %c0_16 = arith.constant 0 : index
    %22 = vector.load %arg8[%c2, %c0_15, %c0_16] : memref<9x1x256xf32, #tpu.memory_space<vmem>>, vector<1x1x256xf32>
    %23 = vector.shape_cast %22 : vector<1x1x256xf32> to vector<1x256xf32>
    %24 = vector.broadcast %23 : vector<1x256xf32> to vector<4x256xf32>
    %25 = arith.mulf %21, %24 : vector<4x256xf32>
    %c8 = arith.constant 8 : index
    %c0_17 = arith.constant 0 : index
    %26 = vector.load %arg10[%c8, %c0_17] : memref<36x256xf32, #tpu.memory_space<vmem>>, vector<4x256xf32>
    tpu.vector_store %arg10[%c8, %c0_17], %25 {strides = array<i32>} : memref<36x256xf32, #tpu.memory_space<vmem>>, vector<4x256xf32>,
    %c1_i32 = arith.constant 1 : i32
    %27 = tpu.dynamic_rotate %8 by %c1_i32 dim 1 : vector<4x256xf32>, i32 -> vector<4x256xf32>
    %c3 = arith.constant 3 : index
    %c0_18 = arith.constant 0 : index
    %c0_19 = arith.constant 0 : index
    %28 = vector.load %arg8[%c3, %c0_18, %c0_19] : memref<9x1x256xf32, #tpu.memory_space<vmem>>, vector<1x1x256xf32>
    %29 = vector.shape_cast %28 : vector<1x1x256xf32> to vector<1x256xf32>
    %30 = vector.broadcast %29 : vector<1x256xf32> to vector<4x256xf32>
    %31 = arith.mulf %27, %30 : vector<4x256xf32>
    %c12 = arith.constant 12 : index
    %c0_20 = arith.constant 0 : index
    %32 = vector.load %arg10[%c12, %c0_20] : memref<36x256xf32, #tpu.memory_space<vmem>>, vector<4x256xf32>
    tpu.vector_store %arg10[%c12, %c0_20], %31 {strides = array<i32>} : memref<36x256xf32, #tpu.memory_space<vmem>>, vector<4x256xf32>,
    %c16 = arith.constant 16 : index
    %c0_21 = arith.constant 0 : index
    %33 = vector.load %arg10[%c16, %c0_21] : memref<36x256xf32, #tpu.memory_space<vmem>>, vector<4x256xf32>
    tpu.vector_store %arg10[%c16, %c0_21], %8 {strides = array<i32>} : memref<36x256xf32, #tpu.memory_space<vmem>>, vector<4x256xf32>,
    %c255_i32 = arith.constant 255 : i32
    %34 = tpu.dynamic_rotate %8 by %c255_i32 dim 1 : vector<4x256xf32>, i32 -> vector<4x256xf32>
    %c5 = arith.constant 5 : index
    %c0_22 = arith.constant 0 : index
    %c0_23 = arith.constant 0 : index
    %35 = vector.load %arg8[%c5, %c0_22, %c0_23] : memref<9x1x256xf32, #tpu.memory_space<vmem>>, vector<1x1x256xf32>
    %36 = vector.shape_cast %35 : vector<1x1x256xf32> to vector<1x256xf32>
    %37 = vector.broadcast %36 : vector<1x256xf32> to vector<4x256xf32>
    %38 = arith.mulf %34, %37 : vector<4x256xf32>
    %c20 = arith.constant 20 : index
    %c0_24 = arith.constant 0 : index
    %39 = vector.load %arg10[%c20, %c0_24] : memref<36x256xf32, #tpu.memory_space<vmem>>, vector<4x256xf32>
    tpu.vector_store %arg10[%c20, %c0_24], %38 {strides = array<i32>} : memref<36x256xf32, #tpu.memory_space<vmem>>, vector<4x256xf32>,
    %c241_i32 = arith.constant 241 : i32
    %40 = tpu.dynamic_rotate %8 by %c241_i32 dim 1 : vector<4x256xf32>, i32 -> vector<4x256xf32>
    %c6 = arith.constant 6 : index
    %c0_25 = arith.constant 0 : index
    %c0_26 = arith.constant 0 : index
    %41 = vector.load %arg8[%c6, %c0_25, %c0_26] : memref<9x1x256xf32, #tpu.memory_space<vmem>>, vector<1x1x256xf32>
    %42 = vector.shape_cast %41 : vector<1x1x256xf32> to vector<1x256xf32>
    %43 = vector.broadcast %42 : vector<1x256xf32> to vector<4x256xf32>
    %44 = arith.mulf %40, %43 : vector<4x256xf32>
    %c24 = arith.constant 24 : index
    %c0_27 = arith.constant 0 : index
    %45 = vector.load %arg10[%c24, %c0_27] : memref<36x256xf32, #tpu.memory_space<vmem>>, vector<4x256xf32>
    tpu.vector_store %arg10[%c24, %c0_27], %44 {strides = array<i32>} : memref<36x256xf32, #tpu.memory_space<vmem>>, vector<4x256xf32>,
    %c240_i32 = arith.constant 240 : i32
    %46 = tpu.dynamic_rotate %8 by %c240_i32 dim 1 : vector<4x256xf32>, i32 -> vector<4x256xf32>
    %c7 = arith.constant 7 : index
    %c0_28 = arith.constant 0 : index
    %c0_29 = arith.constant 0 : index
    %47 = vector.load %arg8[%c7, %c0_28, %c0_29] : memref<9x1x256xf32, #tpu.memory_space<vmem>>, vector<1x1x256xf32>
    %48 = vector.shape_cast %47 : vector<1x1x256xf32> to vector<1x256xf32>
    %49 = vector.broadcast %48 : vector<1x256xf32> to vector<4x256xf32>
    %50 = arith.mulf %46, %49 : vector<4x256xf32>
    %c28 = arith.constant 28 : index
    %c0_30 = arith.constant 0 : index
    %51 = vector.load %arg10[%c28, %c0_30] : memref<36x256xf32, #tpu.memory_space<vmem>>, vector<4x256xf32>
    tpu.vector_store %arg10[%c28, %c0_30], %50 {strides = array<i32>} : memref<36x256xf32, #tpu.memory_space<vmem>>, vector<4x256xf32>,
    %c239_i32 = arith.constant 239 : i32
    %52 = tpu.dynamic_rotate %8 by %c239_i32 dim 1 : vector<4x256xf32>, i32 -> vector<4x256xf32>
    %c8_31 = arith.constant 8 : index
    %c0_32 = arith.constant 0 : index
    %c0_33 = arith.constant 0 : index
    %53 = vector.load %arg8[%c8_31, %c0_32, %c0_33] : memref<9x1x256xf32, #tpu.memory_space<vmem>>, vector<1x1x256xf32>
    %54 = vector.shape_cast %53 : vector<1x1x256xf32> to vector<1x256xf32>
    %55 = vector.broadcast %54 : vector<1x256xf32> to vector<4x256xf32>
    %56 = arith.mulf %52, %55 : vector<4x256xf32>
    %c32 = arith.constant 32 : index
    %c0_34 = arith.constant 0 : index
    %57 = vector.load %arg10[%c32, %c0_34] : memref<36x256xf32, #tpu.memory_space<vmem>>, vector<4x256xf32>
    tpu.vector_store %arg10[%c32, %c0_34], %56 {strides = array<i32>} : memref<36x256xf32, #tpu.memory_space<vmem>>, vector<4x256xf32>,
    %c0_35 = arith.constant 0 : index
    %c0_36 = arith.constant 0 : index
    %58 = vector.load %arg4[%c0_35, %c0_36] : memref<4x36xf32, #tpu.memory_space<vmem>>, vector<4x36xf32>
    %c0_37 = arith.constant 0 : index
    %c0_38 = arith.constant 0 : index
    %59 = vector.load %arg10[%c0_37, %c0_38] : memref<36x256xf32, #tpu.memory_space<vmem>>, vector<36x256xf32>
    %cst_39 = arith.constant dense<0.000000e+00> : vector<4x256xf32>
    %60 = tpu.matmul %58, %59, %cst_39 {dimension_numbers = #tpu.dot_dimension_numbers<[1], [0], [0], [1], [0, 0, 1, 1], [], []>} : vector<4x36xf32>, vector<36x256xf32>, vector<4x256xf32> -> vector<4x256xf32>
    %c0_40 = arith.constant 0 : index
    %c0_41 = arith.constant 0 : index
    %61 = vector.load %arg5[%c0_40, %c0_41] : memref<4x1xf32, #tpu.memory_space<vmem>>, vector<4x1xf32>
    %62 = vector.broadcast %61 : vector<4x1xf32> to vector<4x256xf32>
    %63 = arith.addf %60, %62 : vector<4x256xf32>
    %cst_42 = arith.constant 0.000000e+00 : f32
    %64 = vector.broadcast %cst_42 : f32 to vector<4x256xf32>
    %65 = arith.maximumf %63, %64 : vector<4x256xf32>
    %c0_43 = arith.constant 0 : index
    %c0_44 = arith.constant 0 : index
    %66 = vector.load %arg6[%c0_43, %c0_44] : memref<16x4xf32, #tpu.memory_space<vmem>>, vector<16x4xf32>
    %cst_45 = arith.constant dense<0.000000e+00> : vector<16x256xf32>
    %67 = tpu.matmul %66, %65, %cst_45 {dimension_numbers = #tpu.dot_dimension_numbers<[1], [0], [0], [1], [0, 0, 1, 1], [], []>} : vector<16x4xf32>, vector<4x256xf32>, vector<16x256xf32> -> vector<16x256xf32>
    %c0_46 = arith.constant 0 : index
    %c0_47 = arith.constant 0 : index
    %68 = vector.load %arg7[%c0_46, %c0_47] : memref<16x1xf32, #tpu.memory_space<vmem>>, vector<16x1xf32>
    %69 = vector.broadcast %68 : vector<16x1xf32> to vector<16x256xf32>
    %70 = arith.addf %67, %69 : vector<16x256xf32>
    %71 = arith.addf %70, %1 : vector<16x256xf32>
    %cst_48 = arith.constant 0.000000e+00 : f32
    %72 = vector.broadcast %cst_48 : f32 to vector<16x256xf32>
    %73 = arith.maximumf %71, %72 : vector<16x256xf32>
    %c0_49 = arith.constant 0 : index
    %c0_50 = arith.constant 0 : index
    %c0_51 = arith.constant 0 : index
    %74 = vector.load %arg9[%c0_49, %c0_50, %c0_51] : memref<1x16x256xf32, #tpu.memory_space<vmem>>, vector<1x16x256xf32>
    %75 = vector.shape_cast %74 : vector<1x16x256xf32> to vector<16x256xf32>
    %76 = vector.shape_cast %73 : vector<16x256xf32> to vector<1x16x256xf32>
    tpu.vector_store %arg9[%c0_49, %c0_50, %c0_51], %76 {strides = array<i32>} : memref<1x16x256xf32, #tpu.memory_space<vmem>>, vector<1x16x256xf32>,
    return
  }
  func.func @transform_0(%arg0: i32) -> (i32, i32, i32) {
    %c0_i32 = arith.constant 0 : i32
    %c0_i32_0 = arith.constant 0 : i32
    %c0_i32_1 = arith.constant 0 : i32
    return %arg0, %c0_i32, %c0_i32_0 : i32, i32, i32
  }
  func.func @transform_1(%arg0: i32) -> (i32, i32) {
    %c0_i32 = arith.constant 0 : i32
    %c0_i32_0 = arith.constant 0 : i32
    %c0_i32_1 = arith.constant 0 : i32
    return %c0_i32, %c0_i32_0 : i32, i32
  }
  func.func @transform_2(%arg0: i32) -> (i32, i32) {
    %c0_i32 = arith.constant 0 : i32
    %c0_i32_0 = arith.constant 0 : i32
    %c0_i32_1 = arith.constant 0 : i32
    return %c0_i32, %c0_i32_0 : i32, i32
  }
  func.func @transform_3(%arg0: i32) -> (i32, i32) {
    %c0_i32 = arith.constant 0 : i32
    %c0_i32_0 = arith.constant 0 : i32
    %c0_i32_1 = arith.constant 0 : i32
    return %c0_i32, %c0_i32_0 : i32, i32
  }
  func.func @transform_4(%arg0: i32) -> (i32, i32) {
    %c0_i32 = arith.constant 0 : i32
    %c0_i32_0 = arith.constant 0 : i32
    %c0_i32_1 = arith.constant 0 : i32
    return %c0_i32, %c0_i32_0 : i32, i32
  }
  func.func @transform_5(%arg0: i32) -> (i32, i32) {
    %c0_i32 = arith.constant 0 : i32
    %c0_i32_0 = arith.constant 0 : i32
    %c0_i32_1 = arith.constant 0 : i32
    return %c0_i32, %c0_i32_0 : i32, i32
  }
  func.func @transform_6(%arg0: i32) -> (i32, i32) {
    %c0_i32 = arith.constant 0 : i32
    %c0_i32_0 = arith.constant 0 : i32
    %c0_i32_1 = arith.constant 0 : i32
    return %c0_i32, %c0_i32_0 : i32, i32
  }
  func.func @transform_7(%arg0: i32) -> (i32, i32, i32) {
    %c0_i32 = arith.constant 0 : i32
    %c0_i32_0 = arith.constant 0 : i32
    %c0_i32_1 = arith.constant 0 : i32
    %c0_i32_2 = arith.constant 0 : i32
    return %c0_i32, %c0_i32_0, %c0_i32_1 : i32, i32, i32
  }
  func.func @transform_8(%arg0: i32) -> (i32, i32, i32) {
    %c0_i32 = arith.constant 0 : i32
    %c0_i32_0 = arith.constant 0 : i32
    %c0_i32_1 = arith.constant 0 : i32
    return %arg0, %c0_i32, %c0_i32_0 : i32, i32, i32
  }
}

</mosaic_0001>

<bundles_post_ra>
// kernel: tpu_custom_call.1
= control target key start
LH: loop header
LB: loop body
LE: loop exit
PB: predicated region body
PF: predicated region fallthrough
CT: control target
= control target key end

     0   :  { %13 = vsyncpa [#allocation4], 0  ;;  %s1484_s0 = inlined_call_operand.hbm [shape: f32[2,16,256], index: 0, kind: input, shape index: {}]   ;;  %s1485_s1 = inlined_call_operand.vmem [shape: f32[4,16], index: 1, kind: input, shape index: {}]   ;;  %s1486_s2 = inlined_call_operand.vmem [shape: f32[4,1], index: 2, kind: input, shape index: {}]   ;;  %s1487_s3 = inlined_call_operand.vmem [shape: f32[4,36], index: 3, kind: input, shape index: {}]   ;;  %s1488_s4 = inlined_call_operand.vmem [shape: f32[4,1], index: 4, kind: input, shape index: {}]   ;;  %s1489_s5 = inlined_call_operand.vmem [shape: f32[16,4], index: 5, kind: input, shape index: {}]   ;;  %s1490_s6 = inlined_call_operand.vmem [shape: f32[16,1], index: 6, kind: input, shape index: {}]   ;;  %s1491_s7 = inlined_call_operand.vmem [shape: f32[9,1,256], index: 7, kind: input, shape index: {}]   ;;  %s1492_s8 = inlined_call_operand.hbm [shape: f32[2,16,256], index: 8, kind: output, shape index: {}]  }
   0x1   :  { %15 = vsyncpa [#allocation4 + $0x1], 0 }
   0x2   :  { %16 = vsyncpa [#allocation5], 0 }
   0x3   :  { %18 = vsyncpa [#allocation5 + $0x1], 0  ;;  %s1197_s27 = smov 0   ;;  %s1199_s28 = smov 0  }
   0x4   :  { %s1201_s29 = smov 0   ;;  %s1203_s30 = smov 0  }
   0x5 LB: > { %s1218_s9 = sadd.s32 4294967295, %s1135_s30   ;;  %s935_s10 = sadd.s32 4294967294, %s1135_s30   ;;  %s1135_s30 = sphi %s1203_s30, %s1505_s30   ;;  %s1131_s29 = sphi %s1201_s29, %s1504_s29   ;;  %s1127_s28 = sphi %s1199_s28, %s1503_s28   ;;  %s1123_s27 = sphi %s1197_s27, %s1502_s27  }
   0x6   : > { %s1222_s11 = sadd.s32 1, %s1135_s30   ;;  %s31_s12 = sadd.s32 1, %s1131_s29 }
   0x7   : > { %s28_s13 = ssub.s32 %s1135_s30, %s1222_s11  ;;  %p38_p0 = scmp.ne.s32.totalorder %s1131_s29, %s1127_s28 }
   0x8   : > { %p29_p1 = scmp.eq.s32.totalorder %s28_s13, 0  ;;  %p39_p2 = scmp.eq.s32.totalorder %s1135_s30, 0 }
   0x9   : > { %p44_p3 = scmp.ne.s32.totalorder %s1127_s28, %s1123_s27  ;;  %p45_p4 = scmp.eq.s32.totalorder %s1218_s9, 0 }
   0xa   : > { %s1234_s14 = scalar_select %p29_p1, %s1131_s29, %s31_s12  }
   0xb   : > { %p1236_p5 = por %p39_p2, %p38_p0  ;;  %p1240_p6 = por %p45_p4, %p44_p3 }
   0xc   : > { %p215_p7 = scmp.eq.s32.totalorder %s1218_s9, 1  ;;  %p221_p8 = scmp.eq.s32.totalorder %s935_s10, 1 }
   0xd   : > { %p990_p10 = scmp.lt.s32.totalorder %s1135_s30, 2  ;;  %s262_s19 = sand.u32 1, %s1131_s29  }
   0xe   : > { %p1247_p11 = por %p215_p7, %p38_p0  ;;  %p1251_p12 = por %p221_p8, %p44_p3 }
   0xf   : > { %s964_s20 = sshll.u32 %s1135_s30, 9  ;;  %s938_s21 = sshll.u32 %s262_s19, 5 }
  0x10   : > { %s1496_s17 = scalar_select %p1247_p11, 1, 0 }
  0x11   : > { %s1497_s18 = scalar_select %p1251_p12, 1, 0 }
  0x12   : > { %s1260_s24 = scalar_lea.hbm %s1484_s0, %s964_s20  ;;  %s266_s25 = scalar_lea.vmem [#allocation3], %s938_s21 }
  0x13   : > { %s273_s26 = sshll.u32 %s266_s25, 4  ;;  %p1264_p13 = pnand %p990_p10, %p1236_p5  ;;  %s1268_s26 = int_to_ptr.vmem [resolvable:$true] %s273_s26 }
  0x14   : > { %s1270_s12 = scalar_lea.sflag [#allocation4], %s262_s19  ;;  %s1039_s13 = scalar_lea.hbm %s1260_s24, 512 }
  0x15   : > { %p1040_p0 = scmp.ne.s32.totalorder %s1260_s24, %s1039_s13  ;;  %p1041_p1 = pneg %p1264_p13 }
  0x16   : > { %s1044_s21 = scalar_lea.hbm %s1484_s0, 1024  ;;  %p1045_p4 = scmp.lt.u32.totalorder %s1260_s24, %s1484_s0 }
  0x17   : > { %p1042_p2 = pnand %p1041_p1, %p1040_p0  ;;  %p1046_p5 = scmp.lt.u32.totalorder %s1044_s21, %s1039_s13 }
  0x18   : > { %p1048_p8 = scmp.lt.u32.totalorder %s1039_s13, %s1260_s24 }
  0x19   : > { %p1043_p3 = pneg %p1042_p2  ;;  %p1047_p7 = por %p1046_p5, %p1045_p4 }
  0x1b   : > { %p1049_p10 = por %p1048_p8, %p1047_p7 }
  0x1d   : > { %p1050_p9 = pnand %p1049_p10, %p1043_p3 }
  0x1f   : > { %1053 = shalt.err (!%p1050_p9)
}
  0x20   : > { %s1054_s19 = scalar_lea.vmem %s1268_s26, 512  ;;  %s1137_s25 = smov [#allocation3]  }
  0x21   : > { %p1055_p0 = scmp.ne.s32.totalorder %s1268_s26, %s1054_s19  ;;  %s1059_s20 = sshll.u32 %s1137_s25, 4  ;;  %s1060_s20 = int_to_ptr.vmem [resolvable:$false] %s1059_s20 }
  0x22   : > { %s1061_s15 = scalar_lea.vmem %s1060_s20, 1024  ;;  %p1062_p11 = scmp.lt.s32.totalorder %s1268_s26, %s1060_s20 }
  0x23   : > { %p1057_p2 = pnand %p1055_p0, %p1041_p1  ;;  %p1063_p4 = scmp.lt.s32.totalorder %s1061_s15, %s1054_s19 }
  0x25   : > { %p1058_p12 = pneg %p1057_p2  ;;  %p1064_p5 = por %p1063_p4, %p1062_p11 }
  0x27   : > { %p1065_p7 = pnand %p1064_p5, %p1058_p12 }
  0x29   : > { %1068 = shalt.err (!%p1065_p7)
}
  0x2a   : > { %s1138_s13 = smov 256   ;;  %s1139_s21 = smov 16  }
  0x2b   : > { %985 = dma.hbm_to_vmem [thread:$0]  (!%p1264_p13), %s1260_s24, 512, %s1268_s26, %s1270_s12, %s1138_s13, %s1138_s13, %s1139_s21  }
  0x2c   : > { %p941_p9 = scmp.ge.s32.totalorder %s1135_s30, 1  ;;  %p281_p1 = scmp.lt.s32.totalorder %s1135_s30, 3 }
  0x2e   : > { %p282_p3 = pnand %p941_p9, %p281_p1 }
  0x2f   : > { %s1301_s22 = sand.u32 (!%p282_p3), 1, %s1127_s28  }
  0x30   : > { %285 = sbr.rel (%p282_p3) target bundleno = 894 (0x37e), region = 52  ;;  %s942_s23 = sshll.u32 (!%p282_p3), %s1301_s22, 5 }
  0x31   : > { %s288_s19 = scalar_lea.sflag (!%p282_p3), [#allocation4], %s1301_s22  ;;  %s291_s25 = scalar_lea.vmem (!%p282_p3), [#allocation3], %s942_s23 }
  0x37   : > { %1114 = dma.done.wait (%p1240_p6), %s288_s19, 512  }
  0x38   : > { %1116 = vsyncadd (%p1240_p6), %s288_s19, 4294966784  ;;  %v1140_v0 = vmov 0.0   ;;  %v1141_v1 = vmov 0   ;;  %v1313_v2 = vld [vmem:[%s291_s25 + $0x8] sm:$0xff]  ;;  %v1315_v3 = vld [vmem:[%s291_s25 + $0x18] sm:$0xff]  ;;  %vm335_vm0 = vcmask 130048   ;;  %v416_v20 = vlaneseq }
  0x39   : > { %403 = vmatprep.mubr.f32.mxu0 %v1140_v0  ;;  %1037 = vset.pattern.permute.xlu0 %v1141_v1  ;;  %v1317_v4 = vld [vmem:[%s291_s25] sm:$0xff]  ;;  %v966_v5 = vpack.c.bf16 %v1315_v3, %v1313_v2  ;;  %v1321_v6 = vld [vmem:[%s291_s25 + $0x10] sm:$0xff]  ;;  %s1142_s12 = smov 1   ;;  %s1143_s20 = smov 16   ;;  %v735_v19 = vld [vmem:[%s1490_s6 + $0x8] sm:$0xff]  ;;  %vm652_vm9 = vcmask 1043456  }
  0x3a   : > { %723 = vmatprep.mubr.f32.mxu1 %v1140_v0  ;;  %1038 = vset.pattern.permute.xlu1 %v1141_v1  ;;  %v329_v7 = vld [vmem:[%s1486_s2] sm:$0xf]  ;;  %v968_v8 = vpack.c.bf16 %v1321_v6, %v1317_v4  ;;  %s1144_s15 = smov 17   ;;  %s1145_s13 = smov 15   ;;  %v424_v21 = vshrl.u32 %v416_v20, 7  ;;  %v1343_v22 = vand.u32 127, %v416_v20 }
  0x3b   : > { %332 = vperm.xlu0 %1037, %v329_v7   ;;  %967 = vmatprep.subr.bf16.mxu0 %v966_v5  ;;  %v328_v9 = vld [vmem:[%s1485_s1] sm:$0xf]  ;;  %s1146_s21 = smov 127   ;;  %s1147_s19 = smov 112   ;;  %v947_v25 = vld [vmem:[%s1491_s7 + $0x6] sm:$0x3] }
  0x3c   : > { %969 = vmatpush1.bf16.msra.mxu0 %v968_v8  ;;  %s1148_s25 = smov 113   ;;  %s1149_s16 = smov 111   ;;  %v734_v17 = vld [vmem:[%s1490_s6] sm:$0xff]  ;;  %v1345_v23 = vsub.s32 0, %v424_v21  ;;  %v1347_v24 = vsub.s32 1, %v424_v21  ;;  %vm495_vm1 = vcmp.lt.s32.totalorder %v1343_v22, 1 }
  0x3d   : > { %v642_v18 = vld [vmem:[%s1488_s4] sm:$0xf]  ;;  %vm418_vm2 = vcmp.lt.s32.totalorder %v1343_v22, 17  ;;  %v946_v39 = vld [vmem:[%s1491_s7 + $0x4] sm:$0x3]  ;;  %vm471_vm3 = vcmp.lt.s32.totalorder %v1343_v22, 15 }
  0x3e   : > { %v504_v28 = vrot.slane %v947_v25, %v1345_v23  ;;  %v508_v29 = vrot.slane %v947_v25, %v1347_v24  ;;  %v421_v30 = vld [vmem:[%s1491_s7] sm:$0x3]  ;;  %v945_v46 = vld [vmem:[%s1491_s7 + $0x2] sm:$0x3]  ;;  %v480_v49 = vrot.slane %v946_v39, %v1345_v23  ;;  %v484_v50 = vrot.slane %v946_v39, %v1347_v24  ;;  %v948_v51 = vld [vmem:[%s1491_s7 + $0xa] sm:$0x3] }
  0x3f   : > { %944 = vmatmul.mubr.msk.f32.vlgmr.msra.gmra.mrb[0].mxu0 %vm335_vm0, %v328_v9  ;;  %v426_v37 = vrot.slane %v421_v30, %v1345_v23  ;;  %v430_v38 = vrot.slane %v421_v30, %v1347_v24  ;;  %vm441_vm4 = vcmp.lt.s32.totalorder %v1343_v22, 16  ;;  %v450_v54 = vrot.slane %v945_v46, %v1345_v23  ;;  %v950_v58 = vld [vmem:[%s1491_s7 + $0xe] sm:$0x3]  ;;  %s965_s24 = sshll.u32 %s1218_s9, 9  ;;  %p1499_p11 = scmp.ne.s32.totalorder %s1496_s17, 0 }
  0x40   : > { %823 = vmatprep.mubr.f32.mxu0 %v1140_v0  ;;  %v454_v57 = vrot.slane %v945_v46, %v1347_v24  ;;  %vm527_vm5 = vcmp.lt.s32.totalorder %v1343_v22, 127  ;;  %v536_v61 = vrot.slane %v948_v51, %v1345_v23  ;;  %v540_v62 = vrot.slane %v948_v51, %v1347_v24  ;;  %s1439_s10 = scalar_lea.hbm %s1492_s8, %s965_s24  ;;  %s1150_s9 = smov [#allocation6]  }
  0x41   : > { %vm581_vm6 = vcmp.lt.s32.totalorder %v1343_v22, 112  ;;  %v590_v5 = vrot.slane %v950_v58, %v1345_v23  ;;  %v594_v7 = vrot.slane %v950_v58, %v1347_v24  ;;  %vm557_vm7 = vcmp.lt.s32.totalorder %v1343_v22, 113 }
  0x42   : > { %vm611_vm8 = vcmp.lt.s32.totalorder %v1343_v22, 111  ;;  %vm648_vm10 = vcmask 293888   ;;  %vm746_vm11 = vcmask 31744  }
  0xba   : > { %v333_v10 = vpop.permute.xlu0 %332 }
 0x112   : > { %v405_v11 = vpop.f32.mrb[0].mxu0 }
 0x113   : > { %v406_v12 = vadd.f32 %v405_v11, %v333_v10  ;;  %v407_v13 = vpop.f32.mrb[1].mxu0 }
 0x114   : > { %v408_v14 = vadd.f32 %v407_v13, %v333_v10 }
 0x115   : > { %v410_v15 = vmax.f32 %v406_v12, 0.0 }
 0x116   : > { %v411_v16 = vmax.f32 %v408_v14, 0.0 }
 0x117   : > { %521 = vst [vmem:[#allocation2 + $0x20] sm:$0xf] %v410_v15  ;;  %491 = vrot.lane.b32.xlu1 %v410_v15, %s1142_s12  ;;  %437 = vrot.lane.b32.xlu0 %v410_v15, %s1143_s20 }
 0x118   : > { %522 = vst [vmem:[#allocation2 + $0x28] sm:$0xf] %v411_v16 }
 0x11b   : > { %412 = vrot.lane.b32.xlu1 %v410_v15, %s1144_s15  ;;  %493 = vrot.lane.b32.xlu0 %v411_v16, %s1142_s12  ;;  %s849_s12 = scalar_lea.sflag [#allocation5], %s1301_s22 }
 0x11f   : > { %467 = vrot.lane.b32.xlu1 %v410_v15, %s1145_s13  ;;  %414 = vrot.lane.b32.xlu0 %v411_v16, %s1144_s15 }
 0x123   : > { %523 = vrot.lane.b32.xlu1 %v410_v15, %s1146_s21  ;;  %469 = vrot.lane.b32.xlu0 %v411_v16, %s1145_s13  ;;  %s1073_s13 = sshll.u32 %s1150_s9, 4  ;;  %s1074_s13 = int_to_ptr.vmem [resolvable:$false] %s1073_s13 }
 0x127   : > { %439 = vrot.lane.b32.xlu1 %v411_v16, %s1143_s20  ;;  %525 = vrot.lane.b32.xlu0 %v411_v16, %s1146_s21  ;;  %s1075_s21 = scalar_lea.vmem %s1074_s13, 1024 }
 0x12b   : > { %577 = vrot.lane.b32.xlu1 %v410_v15, %s1147_s19  ;;  %579 = vrot.lane.b32.xlu0 %v411_v16, %s1147_s19 }
 0x12f   : > { %553 = vrot.lane.b32.xlu1 %v410_v15, %s1148_s25  ;;  %555 = vrot.lane.b32.xlu0 %v411_v16, %s1148_s25  ;;  %s323_s25 = scalar_lea.vmem [#allocation6], %s942_s23 }
 0x133   : > { %607 = vrot.lane.b32.xlu1 %v410_v15, %s1149_s16  ;;  %609 = vrot.lane.b32.xlu0 %v411_v16, %s1149_s16  ;;  %v949_v16 = vld [vmem:[%s1491_s7 + $0xc] sm:$0x3]  ;;  %s862_s16 = sshll.u32 %s323_s25, 4  ;;  %s1434_s16 = int_to_ptr.vmem [resolvable:$true] %s862_s16 }
 0x134   : > { %v566_v30 = vrot.slane %v949_v16, %v1345_v23  ;;  %s1069_s15 = scalar_lea.vmem %s1434_s16, 512  ;;  %p1076_p8 = scmp.lt.s32.totalorder %s1434_s16, %s1074_s13 }
 0x135   : > { %p1070_p6 = scmp.ne.s32.totalorder %s1434_s16, %s1069_s15  ;;  %p1077_p10 = scmp.lt.s32.totalorder %s1075_s21, %s1069_s15 }
 0x137   : > { %738 = vperm.xlu0 %1037, %v734_v17   ;;  %645 = vperm.xlu1 %1038, %v642_v18   ;;  %p1071_p12 = pnand %p1070_p6, %p1499_p11  ;;  %p1078_p0 = por %p1077_p10, %p1076_p8 }
 0x139   : > { %p1072_p13 = pneg %p1071_p12 }
 0x13b   : > { %743 = vperm.xlu1 %1038, %v735_v19   ;;  %p1079_p2 = pnand %p1078_p0, %p1072_p13 }
 0x189   : > { %v492_v26 = vpop.permute.xlu1 %491  ;;  %v438_v27 = vpop.permute.xlu0 %437 }
 0x18d   : > { %v413_v31 = vpop.permute.xlu1 %412  ;;  %v494_v32 = vpop.permute.xlu0 %493 }
 0x18e   : > { %v496_v33 = vsel %vm495_vm1, %v492_v26, %v494_v32  ;;  %v497_v34 = vsel %vm495_vm1, %v494_v32, %v492_v26  ;;  %v951_v32 = vld [vmem:[%s1491_s7 + $0x10] sm:$0x3] }
 0x18f   : > { %v511_v35 = vmul.f32 %v504_v28, %v497_v34  ;;  %v512_v36 = vmul.f32 %v508_v29, %v496_v33 }
 0x191   : > { %v515_v40 = vrot.slane %v511_v35, 4  ;;  %v516_v41 = vrot.slane %v512_v36, 4  ;;  %v468_v42 = vpop.permute.xlu1 %467  ;;  %v415_v43 = vpop.permute.xlu0 %414 }
 0x192   : > { %v419_v44 = vsel %vm418_vm2, %v413_v31, %v415_v43  ;;  %v420_v45 = vsel %vm418_vm2, %v415_v43, %v413_v31  ;;  %v570_v31 = vrot.slane %v949_v16, %v1347_v24 }
 0x193   : > { %519 = vst [vmem:[#allocation2 + $0x10] sm:$0xf0] %v515_v40  ;;  %520 = vst [vmem:[#allocation2 + $0x18] sm:$0xf0] %v516_v41  ;;  %v433_v47 = vmul.f32 %v426_v37, %v420_v45  ;;  %v434_v48 = vmul.f32 %v430_v38, %v419_v44  ;;  %v620_v41 = vrot.slane %v951_v32, %v1345_v23 }
 0x195   : > { %435 = vst [vmem:[#allocation2] sm:$0xf] %v433_v47  ;;  %436 = vst [vmem:[#allocation2 + $0x8] sm:$0xf] %v434_v48  ;;  %v524_v52 = vpop.permute.xlu1 %523  ;;  %v470_v53 = vpop.permute.xlu0 %469 }
 0x196   : > { %v472_v55 = vsel %vm471_vm3, %v468_v42, %v470_v53  ;;  %v473_v56 = vsel %vm471_vm3, %v470_v53, %v468_v42  ;;  %v624_v42 = vrot.slane %v951_v32, %v1347_v24 }
 0x197   : > { %v487_v59 = vmul.f32 %v480_v49, %v473_v56  ;;  %v488_v60 = vmul.f32 %v484_v50, %v472_v55 }
 0x199   : > { %489 = vst [vmem:[#allocation2 + $0x10] sm:$0xf] %v487_v59  ;;  %490 = vst [vmem:[#allocation2 + $0x18] sm:$0xf] %v488_v60  ;;  %v440_v63 = vpop.permute.xlu1 %439  ;;  %v526_v1 = vpop.permute.xlu0 %525  ;;  %v631_v59 = vld [vmem:[%s1487_s3] sm:$0xf] }
 0x19a   : > { %v442_v8 = vsel %vm441_vm4, %v438_v27, %v440_v63  ;;  %v443_v9 = vsel %vm441_vm4, %v440_v63, %v438_v27  ;;  %v528_v10 = vsel %vm527_vm5, %v524_v52, %v526_v1  ;;  %v529_v11 = vsel %vm527_vm5, %v526_v1, %v524_v52 }
 0x19b   : > { %v457_v12 = vmul.f32 %v450_v54, %v443_v9  ;;  %v458_v13 = vmul.f32 %v454_v57, %v442_v8  ;;  %v543_v14 = vmul.f32 %v536_v61, %v528_v10  ;;  %v544_v15 = vmul.f32 %v540_v62, %v529_v11  ;;  %v732_v9 = vld [vmem:[%s1489_s5] sm:$0xff]  ;;  %v733_v10 = vld [vmem:[%s1489_s5 + $0x8] sm:$0xff] }
 0x19d   : > { %v461_v17 = vrot.slane %v457_v12, 4  ;;  %v462_v18 = vrot.slane %v458_v13, 4  ;;  %v547_v19 = vrot.slane %v543_v14, 4  ;;  %v548_v20 = vrot.slane %v544_v15, 4  ;;  %v578_v21 = vpop.permute.xlu1 %577  ;;  %v580_v25 = vpop.permute.xlu0 %579 }
 0x19e   : > { %v582_v26 = vsel %vm581_vm6, %v578_v21, %v580_v25  ;;  %v583_v27 = vsel %vm581_vm6, %v580_v25, %v578_v21 }
 0x19f   : > { %465 = vst [vmem:[#allocation2] sm:$0xf0] %v461_v17  ;;  %466 = vst [vmem:[#allocation2 + $0x8] sm:$0xf0] %v462_v18  ;;  %v597_v28 = vmul.f32 %v590_v5, %v582_v26  ;;  %v598_v29 = vmul.f32 %v594_v7, %v583_v27 }
 0x1a0   : > { %551 = vst [vmem:[#allocation2 + $0x20] sm:$0xf0] %v547_v19  ;;  %552 = vst [vmem:[#allocation2 + $0x28] sm:$0xf0] %v548_v20  ;;  %v635_v45 = vld [vmem:[#allocation2 + $0x18] sm:$0xff]  ;;  %v634_v50 = vld [vmem:[#allocation2 + $0x10] sm:$0xff] }
 0x1a1   : > { %v601_v33 = vrot.slane %v597_v28, 4  ;;  %v602_v34 = vrot.slane %v598_v29, 4  ;;  %v554_v35 = vpop.permute.xlu1 %553  ;;  %v556_v36 = vpop.permute.xlu0 %555 }
 0x1a2   : > { %v558_v37 = vsel %vm557_vm7, %v554_v35, %v556_v36  ;;  %v559_v38 = vsel %vm557_vm7, %v556_v36, %v554_v35 }
 0x1a3   : > { %605 = vst [vmem:[#allocation2 + $0x30] sm:$0xf0] %v601_v33  ;;  %606 = vst [vmem:[#allocation2 + $0x38] sm:$0xf0] %v602_v34  ;;  %v573_v39 = vmul.f32 %v566_v30, %v558_v37  ;;  %v574_v40 = vmul.f32 %v570_v31, %v559_v38 }
 0x1a5   : > { %575 = vst [vmem:[#allocation2 + $0x30] sm:$0xf] %v573_v39  ;;  %576 = vst [vmem:[#allocation2 + $0x38] sm:$0xf] %v574_v40  ;;  %v608_v43 = vpop.permute.xlu1 %607  ;;  %v610_v44 = vpop.permute.xlu0 %609 }
 0x1a6   : > { %v612_v46 = vsel %vm611_vm8, %v608_v43, %v610_v44  ;;  %v613_v47 = vsel %vm611_vm8, %v610_v44, %v608_v43  ;;  %v633_v48 = vld [vmem:[#allocation2 + $0x8] sm:$0xff]  ;;  %v632_v49 = vld [vmem:[#allocation2] sm:$0xff] }
 0x1a7   : > { %v627_v51 = vmul.f32 %v620_v41, %v612_v46  ;;  %v628_v22 = vmul.f32 %v624_v42, %v613_v47  ;;  %v970_v52 = vpack.c.bf16 %v635_v45, %v633_v48  ;;  %v972_v53 = vpack.c.bf16 %v634_v50, %v632_v49  ;;  %v637_v23 = vld [vmem:[#allocation2 + $0x28] sm:$0xff]  ;;  %v636_v54 = vld [vmem:[#allocation2 + $0x20] sm:$0xff] }
 0x1a9   : > { %629 = vst [vmem:[#allocation2 + $0x40] sm:$0xf] %v627_v51  ;;  %630 = vst [vmem:[#allocation2 + $0x48] sm:$0xf] %v628_v22  ;;  %971 = vmatprep.subr.bf16.mxu1 %v970_v52 }
 0x1aa   : > { %973 = vmatpush1.bf16.msra.mxu1 %v972_v53 }
 0x1ac   : > { %v639_v24 = vld [vmem:[#allocation2 + $0x38] sm:$0xff]  ;;  %v638_v55 = vld [vmem:[#allocation2 + $0x30] sm:$0xff] }
 0x1ad   : > { %v974_v56 = vpack.c.bf16 %v639_v24, %v637_v23  ;;  %v976_v57 = vpack.c.bf16 %v638_v55, %v636_v54 }
 0x1af   : > { %975 = vmatprep.subr.bf16.mxu1 %v974_v56 }
 0x1b0   : > { %977 = vmatpush1.bf16.msra.mxu1 %v976_v57  ;;  %v641_v58 = vld [vmem:[#allocation2 + $0x48] sm:$0xf]  ;;  %v640_v60 = vld [vmem:[#allocation2 + $0x40] sm:$0xf] }
 0x1b1   : > { %952 = vmatprep.subr.msk.mxu1 %vm652_vm9, %v641_v58 }
 0x1b4   : > { %953 = vmatpush1.msk.msra.mxu1 %vm652_vm9, %v640_v60 }
 0x1b5   : > { %954 = vmatmul.mubr.msk.f32.vlgmr.msra.gmra.mrb[0].mxu1 %vm648_vm10, %v631_v59 }
 0x1b6   : > { %v646_v61 = vpop.permute.xlu1 %645  ;;  %v739_v11 = vpop.permute.xlu0 %738 }
 0x1ba   : > { %v744_v17 = vpop.permute.xlu1 %743 }
 0x288   : > { %v725_v62 = vpop.f32.mrb[0].mxu1 }
 0x289   : > { %v726_v63 = vadd.f32 %v725_v62, %v646_v61  ;;  %v727_v1 = vpop.f32.mrb[1].mxu1 }
 0x28a   : > { %v728_v5 = vadd.f32 %v727_v1, %v646_v61 }
 0x28b   : > { %v730_v8 = vmax.f32 %v726_v63, 0.0 }
 0x28c   : > { %v731_v7 = vmax.f32 %v728_v5, 0.0 }
 0x28e   : > { %955 = vmatprep.subr.msk.mxu0 %vm652_vm9, %v731_v7 }
 0x28f   : > { %956 = vmatpush1.msk.msra.mxu0 %vm652_vm9, %v730_v8 }
 0x290   : > { %957 = vmatmul.mubr.msk.f32.vlgmr.msra.gmra.mrb[2].mxu0 %vm746_vm11, %v732_v9 }
 0x291   : > { %829 = vmatprep.mubr.f32.mxu0 %v1140_v0 }
 0x294   : > { %958 = vmatmul.mubr.msk.f32.gmra.mrb[4].mxu0 %vm746_vm11, %v733_v10 }
 0x363   : > { %v825_v12 = vpop.f32.mrb[2].mxu0 }
 0x364   : > { %v826_v13 = vadd.f32 %v825_v12, %v739_v11  ;;  %v827_v14 = vpop.f32.mrb[3].mxu0 }
 0x365   : > { %v828_v15 = vadd.f32 %v827_v14, %v739_v11 }
 0x366   : > { %v836_v16 = vadd.f32 %v826_v13, %v1317_v4 }
 0x367   : > { %v837_v18 = vadd.f32 %v828_v15, %v1313_v2  ;;  %v831_v19 = vpop.f32.mrb[4].mxu0 }
 0x368   : > { %v840_v20 = vmax.f32 %v836_v16, 0.0  ;;  %v832_v21 = vadd.f32 %v831_v19, %v744_v17  ;;  %v833_v0 = vpop.f32.mrb[5].mxu0 }
 0x369   : > { %v841_v25 = vmax.f32 %v837_v18, 0.0  ;;  %v834_v26 = vadd.f32 %v833_v0, %v744_v17 }
 0x36a   : > { %844 = vst [vmem:[%s323_s25] sm:$0xff] %v840_v20  ;;  %v838_v27 = vadd.f32 %v832_v21, %v1321_v6 }
 0x36b   : > { %845 = vst [vmem:[%s323_s25 + $0x8] sm:$0xff] %v841_v25  ;;  %v839_v4 = vadd.f32 %v834_v26, %v1315_v3 }
 0x36c   : > { %v842_v2 = vmax.f32 %v838_v27, 0.0 }
 0x36d   : > { %v843_v28 = vmax.f32 %v839_v4, 0.0 }
 0x36e   : > { %846 = vst [vmem:[%s323_s25 + $0x10] sm:$0xff] %v842_v2 }
 0x36f   : > { %847 = vst [vmem:[%s323_s25 + $0x18] sm:$0xff] %v843_v28 }
 0x370   : > { %1082 = shalt.err (!%p1079_p2)
}
 0x371   : > { %s1083_s19 = scalar_lea.hbm %s1439_s10, 512  ;;  %s1087_s26 = scalar_lea.hbm %s1492_s8, 1024 }
 0x372   : > { %p1084_p4 = scmp.ne.s32.totalorder %s1439_s10, %s1083_s19  ;;  %p1088_p9 = scmp.lt.u32.totalorder %s1439_s10, %s1492_s8 }
 0x373   : > { %p1089_p1 = scmp.lt.u32.totalorder %s1087_s26, %s1083_s19  ;;  %p1091_p6 = scmp.lt.u32.totalorder %s1083_s19, %s1439_s10 }
 0x374   : > { %p1085_p5 = pnand %p1084_p4, %p1499_p11 }
 0x375   : > { %p1090_p3 = por %p1089_p1, %p1088_p9 }
 0x376   : > { %p1086_p7 = pneg %p1085_p5 }
 0x377   : > { %p1092_p12 = por %p1091_p6, %p1090_p3 }
 0x379   : > { %p1093_p13 = pnand %p1092_p12, %p1086_p7 }
 0x37b   : > { %1096 = shalt.err (!%p1093_p13)
}
 0x37c   : > { %s1151_s15 = smov 256  }
 0x37d   : > { %980 = dma.vmem_to_hbm [thread:$0]  (%p1499_p11), %s1434_s16, 512, %s1439_s10, %s849_s12, %s1151_s15, %s1151_s15, %s1143_s20  }
 0x37e PF: > { %s877_s13 = sand.u32 1, %s1123_s27   ;;  %p1500_p8 = scmp.ne.s32.totalorder %s1497_s18, 0 }
 0x37f   : > { %p1501_p10 = scmp.ge.s32.totalorder %s1135_s30, 2  ;;  %s878_s21 = scalar_lea.sflag [#allocation5], %s877_s13 }
 0x381   : > { %p987_p0 = pnand %p1501_p10, %p1500_p8 }
 0x383   : > { %1118 = dma.done.wait (!%p987_p0), %s878_s21, 512  }
 0x384   : > { %1120 = vsyncadd (!%p987_p0), %s878_s21, 4294966784  ;;  %p21_p2 = scmp.ge.s32.totalorder %s1222_s11, 4   ;;  %s1502_s27 = smov %s1127_s28 }
 0x385   : > { %s1503_s28 = smov %s1131_s29  ;;  %s1504_s29 = smov %s1234_s14 }
 0x386   : > { %s1505_s30 = smov %s1222_s11  ;;  %23 = sbr.rel (!%p21_p2) target bundleno = 5 (0x5), region = 104 }
 0x38d   :  { %883 = vsyncpa [#allocation4], 1 }
 0x38e   :  { %885 = vsyncpa [#allocation4 + $0x1], 1 }
 0x38f   :  { %886 = vsyncpa [#allocation5], 1 }
 0x390   :  { %888 = vsyncpa [#allocation5 + $0x1], 1 }

</bundles_post_ra>
